<compile_context>
chip_gen: v7x
topology: tpu7x:2x2x1
jax: 0.10.0
libtpu: 0.0.40
codegen_flags: <defaults>
</compile_context>

<pallas_src>
import functools
import math

import jax
import jax.numpy as jnp
from jax import lax
from jax.experimental import pallas as pl
from jax.experimental.pallas import tpu as pltpu


def _round_up(v, m):
    return ((v + m - 1) // m) * m


def make_reorder_perm(reorder_index, hidden):
    """One-hot permutation P with P[c, j] = 1 iff c == reorder_index[j].

    (y @ P)[:, j] == y[:, reorder_index[j]] == torch.index_select(y, -1, idx).
    Stored in bf16 (exact for 0/1). Build once per model and pass via `perm=`.
    """
    idx = reorder_index.astype(jnp.int32)
    return (jnp.arange(hidden, dtype=jnp.int32)[:, None] == idx[None, :]
            ).astype(jnp.bfloat16)


def _ln_quant_permute_kernel(x_ref, wb_ref, perm_ref, o_ref, q_ref, scale_ref,
                             *, eps, n_bits):
    """Fused LayerNorm + per-token fake-quant (pre-permute) + MXU channel permute.

    Grid: (row_tiles, col_panels).  At the first column panel of each row tile
    the LayerNorm + quantizer runs once, storing the integer codes (q - zp,
    |.| <= 2**n_bits - 1, bf16-exact) and the per-row scale in VMEM scratch;
    every panel then applies the one-hot permutation as a single-pass bf16
    matmul and rescales.
    """
    j = pl.program_id(1)

    @pl.when(j == 0)
    def _():
        x = x_ref[...].astype(jnp.float32)                      # (TR, H)
        w = wb_ref[0:1, :].astype(jnp.float32)                  # (1, H)
        b = wb_ref[1:2, :].astype(jnp.float32)                  # (1, H)

        # LayerNorm (biased variance, like torch.nn.LayerNorm).
        mean = jnp.mean(x, axis=-1, keepdims=True)
        xc = x - mean
        var = jnp.mean(xc * xc, axis=-1, keepdims=True)
        y = xc * lax.rsqrt(var + eps) * w + b                   # (TR, H)

        # Dynamic per-token asymmetric fake quant.  min/max and the per-row
        # elementwise quantization are permutation-invariant, so quantize
        # BEFORE the channel reorder.
        qmax = float(2 ** n_bits - 1)
        xmax = jnp.max(y, axis=-1, keepdims=True)
        xmin = jnp.min(y, axis=-1, keepdims=True)
        scale = jnp.maximum((xmax - xmin) * (1.0 / qmax), 1e-8)  # floor on scale
        inv_scale = 1.0 / scale        # exact per-row divide ((TR, 1) only)
        zp = jnp.clip(jnp.round(-xmin * inv_scale), 0.0, qmax)
        # zero_point folded into the clip bounds: q == x_quant - zp.
        q = jnp.clip(jnp.round(y * inv_scale), -zp, qmax - zp)

        q_ref[...] = q.astype(jnp.bfloat16)   # integers, |q| <= 255: bf16-exact
        scale_ref[...] = scale

    # Channel reorder as a single-pass bf16 one-hot matmul (exact: each output
    # column selects exactly one bf16-exact integer), then rescale per row.
    qp = jnp.dot(q_ref[...], perm_ref[...], preferred_element_type=jnp.float32)
    o_ref[...] = (qp * scale_ref[...]).astype(o_ref.dtype)


def reorder_layer_norm(x, weight, bias, reorder_index=None, *, eps=1e-5,
                       n_bits=8, row_tile=512, out_dtype=None, perm=None):
    """x: [..., H]; weight/bias: [H]; reorder_index: [H] int permutation.

    Pass a precomputed `perm` (from make_reorder_perm) to avoid rebuilding the
    O(H^2) one-hot every call.  `out_dtype=jnp.bfloat16` halves store traffic
    when the consumer accepts it (data is 8-bit fake-quantized anyway).
    """
    # bf16 permute path is exact only for |q| <= 2**8 - 1.
    assert n_bits <= 8, "bf16 permute path requires n_bits <= 8"

    *lead, H = x.shape
    R = math.prod(lead) if lead else 1
    out_dtype = x.dtype if out_dtype is None else out_dtype

    x2 = x.reshape(R, H)
    wb = jnp.stack([weight, bias]).astype(jnp.float32)           # (2, H)
    if perm is None:
        if reorder_index is None:
            raise ValueError("need reorder_index or a precomputed perm")
        perm = make_reorder_perm(reorder_index, H)
    perm = perm.astype(jnp.bfloat16)

    # Generation-aware VMEM cap (~112 MiB on v5e/v6e, ~56 MiB on v7x).
    try:
        vmem_cap = int(pltpu.get_tpu_info().vmem_capacity_bytes)
    except Exception:
        vmem_cap = 64 << 20
    vmem_limit = max(32 << 20, (vmem_cap * 7) // 8)

    x_isz = jnp.dtype(x2.dtype).itemsize
    o_isz = jnp.dtype(out_dtype).itemsize

    # --- Row tile: as large as practical, but keep >=2 (ideally >=4) balanced
    # tiles so both v7x TensorCores get work on short batches.
    tile = min(int(row_tile), R)
    if R >= 32:
        tile = min(tile, _round_up(pl.cdiv(R, 4), 8))
    elif R >= 16:
        tile = min(tile, _round_up(pl.cdiv(R, 2), 8))
    if tile < R:
        tile = max(8, (tile // 8) * 8)

    margin = 4 << 20

    def fixed_bytes(t):
        return (2 * t * H * x_isz          # x tile, double-buffered
                + 2 * H * 4                # packed weight/bias (single-buffered)
                + t * H * 2                # q scratch (bf16)
                + t * 128 * 4              # per-row scale scratch (lane-padded)
                + 4 * t * H * 4)           # headroom for f32 LN temporaries

    # Shrink the row tile if even a 128-wide column panel would not fit.
    while tile > 8 and (fixed_bytes(tile) + 2 * tile * 128 * o_isz
                        + 2 * H * 128 * 2) > vmem_limit - margin:
        tile = max(8, ((tile // 2) // 8) * 8)

    # --- Column panel: keep the whole (H, H) bf16 one-hot resident
    # (single-buffered) when it fits; otherwise panelize so only an (H, tn)
    # slice lives in VMEM per step (needed for large H on v7x's 64 MiB VMEM).
    full_need = fixed_bytes(tile) + H * H * 2 + 2 * tile * H * o_isz
    if full_need + margin <= vmem_limit:
        tn, n_panels = H, 1
    else:
        avail = vmem_limit - margin - fixed_bytes(tile)
        tn = avail // (4 * H + 2 * tile * o_isz)   # 2-buffered perm + out panel
        tn = min(max(128, (tn // 128) * 128), H)
        n_panels = pl.cdiv(H, tn)

    grid = (pl.cdiv(R, tile), n_panels)

    # Constant-index operands are single-buffered (double-buffering a block
    # whose index never changes only wastes VMEM).
    wb_spec = pl.BlockSpec((2, H), lambda i, j: (0, 0),
                           pipeline_mode=pl.Buffered(1))
    if n_panels == 1:
        perm_spec = pl.BlockSpec((H, tn), lambda i, j: (0, j),
                                 pipeline_mode=pl.Buffered(1))
    else:
        perm_spec = pl.BlockSpec((H, tn), lambda i, j: (0, j))

    kernel = functools.partial(_ln_quant_permute_kernel, eps=eps, n_bits=n_bits)

    out = pl.pallas_call(
        kernel,
        out_shape=jax.ShapeDtypeStruct((R, H), out_dtype),
        grid_spec=pltpu.PrefetchScalarGridSpec(
            num_scalar_prefetch=0,
            grid=grid,
            in_specs=[
                pl.BlockSpec((tile, H), lambda i, j: (i, 0)),   # x rows
                wb_spec,                                        # weight/bias
                perm_spec,                                      # one-hot permute
            ],
            out_specs=pl.BlockSpec((tile, tn), lambda i, j: (i, j)),
            scratch_shapes=[
                pltpu.VMEM((tile, H), jnp.bfloat16),   # q - zp (integer codes)
                pltpu.VMEM((tile, 1), jnp.float32),    # per-row scale
            ],
        ),
        compiler_params=pltpu.CompilerParams(
            dimension_semantics=("parallel", "arbitrary"),
            vmem_limit_bytes=int(vmem_limit)),
    )(x2, wb, perm)

    return out.reshape(x.shape)


def _reference(x, weight, bias, reorder_index, eps=1e-5, n_bits=8):
    """Pure-JAX reference: LayerNorm -> index_select -> per-token fake quant."""
    mean = jnp.mean(x, axis=-1, keepdims=True)
    xc = x - mean
    var = jnp.mean(xc * xc, axis=-1, keepdims=True)
    y = xc * lax.rsqrt(var + eps) * weight + bias
    y = jnp.take(y, reorder_index, axis=-1)
    qmax = float(2 ** n_bits - 1)
    xmax = jnp.max(y, axis=-1, keepdims=True)
    xmin = jnp.min(y, axis=-1, keepdims=True)
    scale = jnp.maximum((xmax - xmin) / qmax, 1e-8)
    zp = jnp.clip(jnp.round(-xmin / scale), 0.0, qmax)
    q = jnp.clip(jnp.round(y / scale) + zp, 0.0, qmax)
    return (q - zp) * scale, scale


if __name__ == "__main__":
    key = jax.random.PRNGKey(0)
    kx, kw, kb, kp = jax.random.split(key, 4)

    B, S, H = 2, 8, 128
    x = jax.random.normal(kx, (B, S, H), dtype=jnp.float32)
    weight = 1.0 + 0.1 * jax.random.normal(kw, (H,), dtype=jnp.float32)
    bias = 0.05 * jax.random.normal(kb, (H,), dtype=jnp.float32)
    reorder_index = jax.random.permutation(kp, jnp.arange(H, dtype=jnp.int32))

    # Build the one-hot permutation once (cacheable across calls).
    perm = make_reorder_perm(reorder_index, H)

    out = reorder_layer_norm(x, weight, bias, reorder_index, perm=perm)
    jax.block_until_ready(out)

    # Sanity check vs pure-JAX reference (tolerance: one quantization level,
    # which covers any ulp-level reduction-order / reciprocal differences).
    ref, ref_scale = _reference(x, weight, bias, reorder_index)
    tol = 1.5 * float(jnp.max(ref_scale)) + 1e-4
    max_err = float(jnp.max(jnp.abs(out.astype(jnp.float32) - ref)))
    assert max_err <= tol, f"max_err={max_err} tol={tol}"

    print("KERNEL_OK")
</pallas_src>

<mosaic_0001>
module attributes {stable_mosaic.version = 11 : i64} {
  func.func @_ln_quant_permute_kernel(%arg0: i32, %arg1: i32, %arg2: memref<8x128xf32, #tpu.memory_space<vmem>>, %arg3: memref<2x128xf32, #tpu.memory_space<vmem>>, %arg4: memref<128x128xbf16, #tpu.memory_space<vmem>>, %arg5: memref<8x128xf32, #tpu.memory_space<vmem>>, %arg6: memref<8x128xbf16, #tpu.memory_space<vmem>>, %arg7: memref<8x1xf32, #tpu.memory_space<vmem>>) attributes {dimension_semantics = [#tpu.dimension_semantics<parallel>, #tpu.dimension_semantics<arbitrary>], iteration_bounds = array<i64: 2, 1>, scalar_prefetch = 0 : i64, scratch_operands = 2 : i64, tpu.core_type = #tpu.core_type<tc>, window_params = [{transform_indices = @transform_0, window_bounds = array<i64: 8, 128>}, {pipeline_mode = #tpu.pipeline_mode<synchronous>, transform_indices = @transform_1, window_bounds = array<i64: 2, 128>}, {pipeline_mode = #tpu.pipeline_mode<synchronous>, transform_indices = @transform_2, window_bounds = array<i64: 128, 128>}, {transform_indices = @transform_3, window_bounds = array<i64: 8, 128>}]} {
    %c0_i32 = arith.constant 0 : i32
    %0 = arith.cmpi eq, %arg1, %c0_i32 : i32
    %1 = arith.extui %0 : i1 to i32
    %c0_i32_0 = arith.constant 0 : i32
    %2 = arith.cmpi ne, %1, %c0_i32_0 : i32
    scf.if %2 {
      %c0_8 = arith.constant 0 : index
      %c0_9 = arith.constant 0 : index
      %10 = vector.load %arg2[%c0_8, %c0_9] : memref<8x128xf32, #tpu.memory_space<vmem>>, vector<8x128xf32>
      %c0_10 = arith.constant 0 : index
      %c0_11 = arith.constant 0 : index
      %11 = vector.load %arg3[%c0_10, %c0_11] : memref<2x128xf32, #tpu.memory_space<vmem>>, vector<1x128xf32>
      %c1 = arith.constant 1 : index
      %c0_12 = arith.constant 0 : index
      %12 = vector.load %arg3[%c1, %c0_12] : memref<2x128xf32, #tpu.memory_space<vmem>>, vector<1x128xf32>
      %cst_13 = arith.constant dense<0.000000e+00> : vector<8xf32>
      %13 = vector.multi_reduction <add>, %10, %cst_13 [1] : vector<8x128xf32> to vector<8xf32>
      %14 = vector.shape_cast %13 : vector<8xf32> to vector<8x1xf32>
      %cst_14 = arith.constant 1.280000e+02 : f32
      %15 = vector.broadcast %cst_14 : f32 to vector<8x1xf32>
      %16 = arith.divf %14, %15 : vector<8x1xf32>
      %17 = vector.broadcast %16 : vector<8x1xf32> to vector<8x128xf32>
      %18 = arith.subf %10, %17 : vector<8x128xf32>
      %19 = arith.mulf %18, %18 : vector<8x128xf32>
      %cst_15 = arith.constant dense<0.000000e+00> : vector<8xf32>
      %20 = vector.multi_reduction <add>, %19, %cst_15 [1] : vector<8x128xf32> to vector<8xf32>
      %21 = vector.shape_cast %20 : vector<8xf32> to vector<8x1xf32>
      %cst_16 = arith.constant 1.280000e+02 : f32
      %22 = vector.broadcast %cst_16 : f32 to vector<8x1xf32>
      %23 = arith.divf %21, %22 : vector<8x1xf32>
      %cst_17 = arith.constant 9.99999974E-6 : f32
      %24 = vector.broadcast %cst_17 : f32 to vector<8x1xf32>
      %25 = arith.addf %23, %24 : vector<8x1xf32>
      %26 = math.rsqrt %25 : vector<8x1xf32>
      %27 = vector.broadcast %26 : vector<8x1xf32> to vector<8x128xf32>
      %28 = arith.mulf %18, %27 : vector<8x128xf32>
      %29 = vector.broadcast %11 : vector<1x128xf32> to vector<8x128xf32>
      %30 = arith.mulf %28, %29 : vector<8x128xf32>
      %31 = vector.broadcast %12 : vector<1x128xf32> to vector<8x128xf32>
      %32 = arith.addf %30, %31 : vector<8x128xf32>
      %cst_18 = arith.constant dense<0xFF800000> : vector<8xf32>
      %33 = vector.multi_reduction <maximumf>, %32, %cst_18 [1] : vector<8x128xf32> to vector<8xf32>
      %34 = vector.shape_cast %33 : vector<8xf32> to vector<8x1xf32>
      %cst_19 = arith.constant dense<0x7F800000> : vector<8xf32>
      %35 = vector.multi_reduction <minimumf>, %32, %cst_19 [1] : vector<8x128xf32> to vector<8xf32>
      %36 = vector.shape_cast %35 : vector<8xf32> to vector<8x1xf32>
      %37 = arith.subf %34, %36 : vector<8x1xf32>
      %cst_20 = arith.constant 0.00392156886 : f32
      %38 = vector.broadcast %cst_20 : f32 to vector<8x1xf32>
      %39 = arith.mulf %37, %38 : vector<8x1xf32>
      %cst_21 = arith.constant 9.99999993E-9 : f32
      %40 = vector.broadcast %cst_21 : f32 to vector<8x1xf32>
      %41 = arith.maximumf %39, %40 : vector<8x1xf32>
      %cst_22 = arith.constant 1.000000e+00 : f32
      %42 = vector.broadcast %cst_22 : f32 to vector<8x1xf32>
      %43 = arith.divf %42, %41 : vector<8x1xf32>
      %cst_23 = arith.constant 0.000000e+00 : f32
      %44 = vector.broadcast %cst_23 : f32 to vector<8x1xf32>
      %45 = arith.subf %44, %36 : vector<8x1xf32>
      %46 = arith.mulf %45, %43 : vector<8x1xf32>
      %47 = math.roundeven %46 : vector<8x1xf32>
      %cst_24 = arith.constant 0.000000e+00 : f32
      %cst_25 = arith.constant 2.550000e+02 : f32
      %48 = vector.broadcast %cst_24 : f32 to vector<8x1xf32>
      %49 = arith.maximumf %48, %47 : vector<8x1xf32>
      %50 = vector.broadcast %cst_25 : f32 to vector<8x1xf32>
      %51 = arith.minimumf %50, %49 : vector<8x1xf32>
      %52 = vector.broadcast %43 : vector<8x1xf32> to vector<8x128xf32>
      %53 = arith.mulf %32, %52 : vector<8x128xf32>
      %54 = math.roundeven %53 : vector<8x128xf32>
      %cst_26 = arith.constant 0.000000e+00 : f32
      %55 = vector.broadcast %cst_26 : f32 to vector<8x1xf32>
      %56 = arith.subf %55, %51 : vector<8x1xf32>
      %cst_27 = arith.constant 2.550000e+02 : f32
      %57 = vector.broadcast %cst_27 : f32 to vector<8x1xf32>
      %58 = arith.subf %57, %51 : vector<8x1xf32>
      %59 = vector.broadcast %56 : vector<8x1xf32> to vector<8x128xf32>
      %60 = arith.maximumf %59, %54 : vector<8x128xf32>
      %61 = vector.broadcast %58 : vector<8x1xf32> to vector<8x128xf32>
      %62 = arith.minimumf %61, %60 : vector<8x128xf32>
      %63 = arith.truncf %62 : vector<8x128xf32> to vector<8x128xbf16>
      %c0_28 = arith.constant 0 : index
      %c0_29 = arith.constant 0 : index
      %64 = vector.load %arg6[%c0_28, %c0_29] : memref<8x128xbf16, #tpu.memory_space<vmem>>, vector<8x128xbf16>
      tpu.vector_store %arg6[%c0_28, %c0_29], %63 {strides = array<i32>} : memref<8x128xbf16, #tpu.memory_space<vmem>>, vector<8x128xbf16>,
      %c0_30 = arith.constant 0 : index
      %c0_31 = arith.constant 0 : index
      %65 = vector.load %arg7[%c0_30, %c0_31] : memref<8x1xf32, #tpu.memory_space<vmem>>, vector<8x1xf32>
      tpu.vector_store %arg7[%c0_30, %c0_31], %41 {strides = array<i32>} : memref<8x1xf32, #tpu.memory_space<vmem>>, vector<8x1xf32>,
    } else {
    }
    %c0 = arith.constant 0 : index
    %c0_1 = arith.constant 0 : index
    %3 = vector.load %arg6[%c0, %c0_1] : memref<8x128xbf16, #tpu.memory_space<vmem>>, vector<8x128xbf16>
    %c0_2 = arith.constant 0 : index
    %c0_3 = arith.constant 0 : index
    %4 = vector.load %arg4[%c0_2, %c0_3] : memref<128x128xbf16, #tpu.memory_space<vmem>>, vector<128x128xbf16>
    %cst = arith.constant dense<0.000000e+00> : vector<8x128xf32>
    %5 = tpu.matmul %3, %4, %cst {dimension_numbers = #tpu.dot_dimension_numbers<[1], [0], [0], [1], [0, 0, 1, 1], [], []>} : vector<8x128xbf16>, vector<128x128xbf16>, vector<8x128xf32> -> vector<8x128xf32>
    %c0_4 = arith.constant 0 : index
    %c0_5 = arith.constant 0 : index
    %6 = vector.load %arg7[%c0_4, %c0_5] : memref<8x1xf32, #tpu.memory_space<vmem>>, vector<8x1xf32>
    %7 = vector.broadcast %6 : vector<8x1xf32> to vector<8x128xf32>
    %8 = arith.mulf %5, %7 : vector<8x128xf32>
    %c0_6 = arith.constant 0 : index
    %c0_7 = arith.constant 0 : index
    %9 = vector.load %arg5[%c0_6, %c0_7] : memref<8x128xf32, #tpu.memory_space<vmem>>, vector<8x128xf32>
    tpu.vector_store %arg5[%c0_6, %c0_7], %8 {strides = array<i32>} : memref<8x128xf32, #tpu.memory_space<vmem>>, vector<8x128xf32>,
    return
  }
  func.func @transform_0(%arg0: i32, %arg1: i32) -> (i32, i32) {
    %c0_i32 = arith.constant 0 : i32
    %c0_i32_0 = arith.constant 0 : i32
    return %arg0, %c0_i32 : i32, i32
  }
  func.func @transform_1(%arg0: i32, %arg1: i32) -> (i32, i32) {
    %c0_i32 = arith.constant 0 : i32
    %c0_i32_0 = arith.constant 0 : i32
    %c0_i32_1 = arith.constant 0 : i32
    return %c0_i32, %c0_i32_0 : i32, i32
  }
  func.func @transform_2(%arg0: i32, %arg1: i32) -> (i32, i32) {
    %c0_i32 = arith.constant 0 : i32
    %c0_i32_0 = arith.constant 0 : i32
    return %c0_i32, %arg1 : i32, i32
  }
  func.func @transform_3(%arg0: i32, %arg1: i32) -> (i32, i32) {
    %c0_i32 = arith.constant 0 : i32
    return %arg0, %arg1 : i32, i32
  }
}

</mosaic_0001>

<bundles_post_ra>
// kernel: tpu_custom_call.1
= control target key start
LH: loop header
LB: loop body
LE: loop exit
PB: predicated region body
PF: predicated region fallthrough
CT: control target
= control target key end

     0   :  { %8 = vsyncpa [#allocation5], 0  ;;  %s1040_s0 = inlined_call_operand.hbm [shape: f32[16,128], index: 0, kind: input, shape index: {}]   ;;  %s1041_s1 = inlined_call_operand.vmem [shape: f32[2,128], index: 1, kind: input, shape index: {}]   ;;  %s1042_s2 = inlined_call_operand.hbm [shape: bf16[128,128], index: 2, kind: input, shape index: {}]   ;;  %s1043_s3 = inlined_call_operand.hbm [shape: f32[16,128], index: 3, kind: output, shape index: {}]  }
   0x1   :  { %10 = vsyncpa [#allocation5 + $0x1], 0 }
   0x2   :  { %11 = vsyncpa [#allocation8], 0 }
   0x3   :  { %12 = vsyncpa [#allocation6], 0 }
   0x4   :  { %14 = vsyncpa [#allocation6 + $0x1], 0  ;;  %s816_s12 = smov 0   ;;  %s818_s13 = smov 0  }
   0x5   :  { %s820_s14 = smov 0   ;;  %s822_s15 = smov 0  }
   0x6   :  { %s824_s16 = smov 0   ;;  %s826_s17 = smov 0  }
   0x7 LB: > { %s495_s18 = sadd.s32 4294967295, %s786_s17   ;;  %s496_s19 = sadd.s32 4294967294, %s786_s17   ;;  %s786_s17 = sphi %s826_s17, %s20_s17   ;;  %s782_s16 = sphi %s824_s16, %s1067_s16   ;;  %s778_s15 = sphi %s822_s15, %s1066_s15   ;;  %s774_s14 = sphi %s820_s14, %s1065_s14   ;;  %s770_s13 = sphi %s818_s13, %s1064_s13   ;;  %s766_s12 = sphi %s816_s12, %s1063_s12  }
   0x8   : > { %p52_p0 = scmp.ne.s32.totalorder %s770_s13, %s766_s12  ;;  %p850_p1 = scmp.eq.s32.totalorder %s495_s18, 0 }
   0x9   : > { %p854_p2 = scmp.eq.s32.totalorder %s495_s18, 1  ;;  %p131_p3 = scmp.eq.s32.totalorder %s496_s19, 1 }
   0xa   : > { %s1048_s20 = scalar_select %p850_p1, 1, 0 }
   0xb   : > { %s1049_s21 = scalar_select %p854_p2, 1, 0 }
   0xc   : > { %p860_p4 = por %p850_p1, %p52_p0  ;;  %p497_p5 = scmp.ge.s32.totalorder %s786_s17, 1 }
   0xd   : > { %p865_p6 = por %p131_p3, %p52_p0  ;;  %p138_p7 = scmp.lt.s32.totalorder %s786_s17, 3 }
   0xe   : > { %s1050_s22 = scalar_select %p860_p4, 1, 0 }
   0xf   : > { %s1051_s23 = scalar_select %p865_p6, 1, 0 }
  0x10   : > { %p870_p8 = pnand %p497_p5, %p138_p7  ;;  %s788_s25 = smov [#allocation7]  }
  0x11   : > { %s155_s26 = sshll.u32 %s788_s25, 4  ;;  %s32_s28 = sadd.s32 1, %s782_s16  ;;  %s156_s26 = int_to_ptr.vmem [resolvable:$true] %s155_s26 }
  0x12   : > { %s1052_s24 = scalar_select %p870_p8, 1, 0 }
  0x13   : > { %p559_p9 = pneg %p870_p8  ;;  %s642_s4 = scalar_lea.hbm %s1042_s2, 1024 }
  0x14   : > { %p643_p12 = scmp.ne.s32.totalorder %s1042_s2, %s642_s4  ;;  %p649_p5 = scmp.lt.u32.totalorder %s642_s4, %s1042_s2 }
  0x15   : > { %p879_p11 = pnand %p559_p9, %p850_p1 }
  0x17   : > { %p644_p13 = pneg %p879_p11 }
  0x19   : > { %p645_p0 = pnand %p644_p13, %p643_p12 }
  0x1b   : > { %p646_p3 = pneg %p645_p0 }
  0x1d   : > { %p651_p7 = pnand %p649_p5, %p646_p3 }
  0x1f   : > { %654 = shalt.err (!%p651_p7)
}
  0x20   : > { %s655_s9 = scalar_lea.vmem %s156_s26, 1024  ;;  %p663_p1 = scmp.lt.s32.totalorder %s156_s26, %s156_s26 }
  0x21   : > { %p656_p9 = scmp.ne.s32.totalorder %s156_s26, %s655_s9  ;;  %p664_p4 = scmp.lt.s32.totalorder %s655_s9, %s655_s9 }
  0x23   : > { %p658_p10 = pnand %p656_p9, %p644_p13  ;;  %p665_p8 = por %p664_p4, %p663_p1 }
  0x25   : > { %p659_p6 = pneg %p658_p10 }
  0x27   : > { %p666_p2 = pnand %p665_p8, %p659_p6 }
  0x29   : > { %669 = shalt.err (!%p666_p2)
}
  0x2a   : > { %s789_s10 = smov 64   ;;  %s790_s11 = smov 4  }
  0x2b   : > { %562 = dma.hbm_to_vmem [thread:$0]  (!%p879_p11), %s1042_s2, 1024, %s156_s26, [#allocation8], %s789_s10, %s789_s10, %s790_s11  }
  0x2c   : > { %p34_p1 = scmp.ge.s32.totalorder %s32_s28, 2  ;;  %s39_s25 = sadd.s32 1, %s774_s14 }
  0x2d   : > { %p46_p2 = scmp.ne.s32.totalorder %s774_s14, %s770_s13  ;;  %p47_p4 = scmp.eq.s32.totalorder %s786_s17, 0 }
  0x2e   : > { %s1069_s28 = smov (%p34_p1, %s32_s28), 0  ;;  %p1055_p8 = scmp.ne.s32.totalorder %s1049_s21, 0 }
  0x2f   : > { %p906_p6 = por %p47_p4, %p46_p2  ;;  %s36_s27 = ssub.s32 %s782_s16, %s1069_s28 }
  0x30   : > { %p912_p10 = por %p1055_p8, %p46_p2  ;;  %p572_p12 = scmp.lt.s32.totalorder %s786_s17, 2 }
  0x31   : > { %p37_p11 = scmp.eq.s32.totalorder %s36_s27, 0  ;;  %s169_s26 = sand.u32 1, %s774_s14  }
  0x32   : > { %s500_s4 = sshll.u32 %s169_s26, 3  ;;  %s501_s6 = sshll.u32 %s782_s16, 7 }
  0x33   : > { %s921_s5 = scalar_select %p37_p11, %s774_s14, %s39_s25  }
  0x34   : > { %s927_s9 = scalar_lea.hbm %s1040_s0, %s501_s6  ;;  %s173_s21 = scalar_lea.vmem [#allocation4], %s500_s4 }
  0x35   : > { %s180_s10 = sshll.u32 %s173_s21, 4  ;;  %p933_p13 = pnand %p572_p12, %p906_p6  ;;  %s929_s10 = int_to_ptr.vmem [resolvable:$true] %s180_s10 }
  0x36   : > { %s170_s18 = scalar_lea.sflag [#allocation5], %s169_s26  ;;  %s670_s19 = scalar_lea.hbm %s927_s9, 128 }
  0x37   : > { %p671_p0 = scmp.ne.s32.totalorder %s927_s9, %s670_s19  ;;  %p672_p3 = pneg %p933_p13 }
  0x38   : > { %s675_s4 = scalar_lea.hbm %s1040_s0, 256  ;;  %p676_p9 = scmp.lt.u32.totalorder %s927_s9, %s1040_s0 }
  0x39   : > { %p673_p5 = pnand %p672_p3, %p671_p0  ;;  %p677_p1 = scmp.lt.u32.totalorder %s675_s4, %s670_s19 }
  0x3a   : > { %p679_p4 = scmp.lt.u32.totalorder %s670_s19, %s927_s9 }
  0x3b   : > { %p674_p7 = pneg %p673_p5  ;;  %p678_p2 = por %p677_p1, %p676_p9 }
  0x3d   : > { %p680_p6 = por %p679_p4, %p678_p2 }
  0x3f   : > { %p681_p8 = pnand %p680_p6, %p674_p7 }
  0x41   : > { %684 = shalt.err (!%p681_p8)
}
  0x42   : > { %s685_s26 = scalar_lea.vmem %s929_s10, 128  ;;  %s791_s7 = smov [#allocation4]  }
  0x43   : > { %p686_p12 = scmp.ne.s32.totalorder %s929_s10, %s685_s26  ;;  %s690_s8 = sshll.u32 %s791_s7, 4  ;;  %s691_s8 = int_to_ptr.vmem [resolvable:$false] %s690_s8 }
  0x44   : > { %s692_s21 = scalar_lea.vmem %s691_s8, 256  ;;  %p693_p5 = scmp.lt.s32.totalorder %s929_s10, %s691_s8 }
  0x45   : > { %p688_p11 = pnand %p686_p12, %p672_p3  ;;  %p694_p9 = scmp.lt.s32.totalorder %s692_s21, %s685_s26 }
  0x47   : > { %p689_p0 = pneg %p688_p11  ;;  %p695_p1 = por %p694_p9, %p693_p5 }
  0x49   : > { %p696_p2 = pnand %p695_p1, %p689_p0 }
  0x4b   : > { %699 = shalt.err (!%p696_p2)
}
  0x4c   : > { %566 = dma.hbm_to_vmem [thread:$0]  (!%p933_p13), %s927_s9, 128, %s929_s10, %s170_s18  }
  0x4d   : > { %p1058_p7 = scmp.ne.s32.totalorder %s1052_s24, 0 }
  0x4e   : > { %s965_s19 = sand.u32 (!%p1058_p7), 1, %s770_s13   ;;  %p1059_p3 = scmp.ne.s32.totalorder (!%p1058_p7), %s1050_s22, 0 }
  0x4f   : > { %189 = sbr.rel (%p1058_p7) target bundleno = 817 (0x331), region = 32  ;;  %s503_s25 = sshll.u32 (!%p1058_p7), %s965_s19, 3 }
  0x50   : > { %s192_s27 = scalar_lea.sflag (!%p1058_p7), [#allocation5], %s965_s19  ;;  %s195_s4 = scalar_lea.vmem (!%p1058_p7), [#allocation4], %s503_s25 }
  0x56   : > { %753 = dma.done.wait (%p1059_p3), %s192_s27, 128  }
  0x57   : > { %755 = vsyncadd (%p1059_p3), %s192_s27, 4294967168  ;;  %p1060_p13 = scmp.ne.s32.totalorder %s1048_s20, 0 }
  0x59   : > { %757 = dma.done.wait (%p1060_p13), [#allocation8], 1024  }
  0x5a   : > { %759 = vsyncadd (%p1060_p13), [#allocation8], 4294966272  ;;  %v227_v0 = vld [vmem:[%s195_s4] sm:$0xff]  ;;  %v506_v9 = vld [vmem:[%s1041_s1] ss:$0 sm:$0xff]  ;;  %v792_v15 = vmov 0.0  }
  0x5b   : > { %230 = vadd.xlane.f32.xlu0 %v227_v0  ;;  %v507_v11 = vld [vmem:[%s1041_s1 + $0x1] ss:$0 sm:$0xff]  ;;  %529 = vmatprep.subr.bf16.mxu0 %v792_v15  ;;  %v631_v16 = vld [vmem:[#allocation7 + $0x8] sm:$0xff]   ;;  %v793_v17 = vmov 0   ;;  %v632_v18 = vld [vmem:[#allocation7 + $0x10] sm:$0xff]   ;;  %vm794_vm0 = vmmov 0  }
  0x5c   : > { %v630_v14 = vld [vmem:[#allocation7] sm:$0xff]   ;;  %629 = vset.pattern.permute.xlu0 %v793_v17  ;;  %v633_v19 = vld [vmem:[#allocation7 + $0x18] sm:$0xff]   ;;  %v635_v21 = vld [vmem:[#allocation7 + $0x28] sm:$0xff]   ;;  %545 = vmatprep.mubr.msk.bf16.mxu0 %vm794_vm0, %v792_v15  ;;  %vm274_vm1 = vcmask 7168   ;;  %s517_s10 = sshll.u32 %s778_s15, 7  ;;  %s221_s11 = scalar_lea.vmem [#allocation9], %s503_s25 }
  0x5d   : > { %530 = vmatpush3.bf16.msra.mxu0 %v630_v14  ;;  %v634_v20 = vld [vmem:[#allocation7 + $0x20] sm:$0xff]   ;;  %v636_v22 = vld [vmem:[#allocation7 + $0x30] sm:$0xff]   ;;  %v637_v23 = vld [vmem:[#allocation7 + $0x38] sm:$0xff]   ;;  %s404_s18 = sshll.u32 %s221_s11, 4  ;;  %s991_s26 = scalar_lea.hbm %s1043_s3, %s517_s10  ;;  %s993_s18 = int_to_ptr.vmem [resolvable:$true] %s404_s18 }
  0x5e   : > { %531 = vmatprep.subr.bf16.mxu0 %v792_v15  ;;  %s390_s15 = scalar_lea.sflag [#allocation6], %s965_s19  ;;  %s700_s7 = scalar_lea.vmem %s993_s18, 128 }
  0x5f   : > { %p701_p4 = scmp.ne.s32.totalorder %s993_s18, %s700_s7  ;;  %s795_s8 = smov [#allocation9]  }
  0x60   : > { %s704_s21 = sshll.u32 %s795_s8, 4  ;;  %s705_s21 = int_to_ptr.vmem [resolvable:$false] %s704_s21 }
  0x61   : > { %532 = vmatpush3.bf16.msra.mxu0 %v631_v16  ;;  %p702_p6 = pnand %p701_p4, %p912_p10  ;;  %s706_s25 = scalar_lea.vmem %s705_s21, 256 }
  0x62   : > { %533 = vmatprep.subr.bf16.mxu0 %v792_v15  ;;  %p707_p12 = scmp.lt.s32.totalorder %s993_s18, %s705_s21  ;;  %p708_p11 = scmp.lt.s32.totalorder %s706_s25, %s700_s7 }
  0x63   : > { %p703_p8 = pneg %p702_p6 }
  0x64   : > { %p709_p0 = por %p708_p11, %p707_p12 }
  0x65   : > { %534 = vmatpush3.bf16.msra.mxu0 %v632_v18 }
  0x66   : > { %535 = vmatprep.subr.bf16.mxu0 %v792_v15  ;;  %p710_p5 = pnand %p709_p0, %p703_p8 }
  0x69   : > { %536 = vmatpush3.bf16.msra.mxu0 %v633_v19 }
  0x6a   : > { %537 = vmatprep.subr.bf16.mxu0 %v792_v15 }
  0x6d   : > { %538 = vmatpush3.bf16.msra.mxu0 %v634_v20 }
  0x6e   : > { %539 = vmatprep.subr.bf16.mxu0 %v792_v15 }
  0x71   : > { %540 = vmatpush3.bf16.msra.mxu0 %v635_v21 }
  0x72   : > { %541 = vmatprep.subr.bf16.mxu0 %v792_v15 }
  0x75   : > { %542 = vmatpush3.bf16.msra.mxu0 %v636_v22 }
  0x76   : > { %543 = vmatprep.subr.bf16.mxu0 %v792_v15 }
  0x79   : > { %544 = vmatpush3.bf16.msra.mxu0 %v637_v23 }
  0xe8   : > { %v231_v1 = vpop.xlane.xlu0 %230 }
  0xe9   : > { %v233_v2 = vmul.f32 0.0078125, %v231_v1 }
  0xeb   : > { %v234_v3 = vsub.f32 %v227_v0, %v233_v2 }
  0xed   : > { %v235_v4 = vmul.f32 %v234_v3, %v234_v3 }
  0xef   : > { %236 = vadd.xlane.f32.xlu0 %v235_v4 }
 0x17c   : > { %v237_v5 = vpop.xlane.xlu0 %236 }
 0x17d   : > { %v238_v6 = vmul.f32 0.0078125, %v237_v5 }
 0x17f   : > { %v239_v7 = vadd.f32 1e-05, %v238_v6 }
 0x181   : > { %638 = vrsqrt.f32 %v239_v7 }
 0x18b   : > { %v639_v8 = vpop.eup %638 }
 0x18c   : > { %v241_v10 = vmul.f32 %v639_v8, %v234_v3 }
 0x18e   : > { %v246_v12 = vmul.f32 %v506_v9, %v241_v10 }
 0x190   : > { %v251_v13 = vadd.f32 %v507_v11, %v246_v12 }
 0x192   : > { %252 = vmax.xlane.f32.xlu1 %v251_v13 }
 0x196   : > { %254 = vmin.xlane.f32.xlu1 %v251_v13 }
 0x21f   : > { %v253_v24 = vpop.xlane.xlu1 %252 }
 0x223   : > { %v255_v25 = vpop.xlane.xlu1 %254 }
 0x224   : > { %v256_v26 = vsub.f32 %v253_v24, %v255_v25  ;;  %v261_v30 = vsub.f32 0.0, %v255_v25 }
 0x226   : > { %v257_v27 = vmul.f32 0.003921569, %v256_v26 }
 0x228   : > { %v258_v28 = vmax.f32 %v257_v27, 1e-08 }
 0x22a   : > { %640 = vrcp.f32 %v258_v28  ;;  %275 = vst.msk [vmem:[#allocation3] sm:$0xff] %vm274_vm1, %v258_v28 }
 0x231   : > { %v381_v29 = vld [vmem:[#allocation3] sm:$0xff] }
 0x232   : > { %384 = vperm.xlu0 %629, %v381_v29  }
 0x234   : > { %v641_v31 = vpop.eup %640 }
 0x235   : > { %v262_v32 = vmul.f32 %v641_v31, %v261_v30  ;;  %v266_v35 = vmul.f32 %v641_v31, %v251_v13 }
 0x237   : > { %v549_v33 = vround.rtne.f32 %v262_v32  ;;  %v550_v37 = vround.rtne.f32 %v266_v35 }
 0x239   : > { %v264_v34 = vmax.f32 %v549_v33, 0.0 }
 0x23b   : > { %v265_v36 = vmin.f32 %v264_v34, 255.0 }
 0x23d   : > { %v268_v38 = vsub.f32 0.0, %v265_v36  ;;  %v269_v39 = vsub.f32 255.0, %v265_v36 }
 0x23f   : > { %v270_v40 = vmax.f32 %v268_v38, %v550_v37 }
 0x241   : > { %v271_v41 = vmin.f32 %v269_v39, %v270_v40 }
 0x243   : > { %v272_v42 = vpack.c.bf16 %v271_v41, %v271_v41 }
 0x245   : > { %273 = vst [vmem:[#allocation2] sm:$0xf] %v272_v42 }
 0x24c   : > { %v276_v43 = vld [vmem:[#allocation2] sm:$0xf] }
 0x24d   : > { %546 = vmatmul.mubr.bf16.vlgmr.msra.gmra.mrb[0].mxu0 %v276_v43 }
 0x2b1   : > { %v385_v44 = vpop.permute.xlu0 %384 }
 0x320   : > { %v375_v45 = vpop.f32.mrb[0].mxu0 }
 0x321   : > { %v387_v46 = vmul.f32 %v385_v44, %v375_v45  ;;  %v547_v47 = vpop.f32.mrb[1].mxu0 }
 0x322   : > { %v378_v48 = vpop.f32.mrb[2].mxu0 }
 0x323   : > { %388 = vst [vmem:[%s221_s11] sm:$0xff] %v387_v46  ;;  %v548_v49 = vpop.f32.mrb[3].mxu0 }
 0x324   : > { %713 = shalt.err (!%p710_p5)
}
 0x325   : > { %s714_s19 = scalar_lea.hbm %s991_s26, 128  ;;  %s718_s22 = scalar_lea.hbm %s1043_s3, 256 }
 0x326   : > { %p715_p9 = scmp.ne.s32.totalorder %s991_s26, %s714_s19  ;;  %p719_p7 = scmp.lt.u32.totalorder %s991_s26, %s1043_s3 }
 0x327   : > { %p720_p3 = scmp.lt.u32.totalorder %s718_s22, %s714_s19  ;;  %p722_p4 = scmp.lt.u32.totalorder %s714_s19, %s991_s26 }
 0x328   : > { %p716_p1 = pnand %p715_p9, %p912_p10 }
 0x329   : > { %p721_p13 = por %p720_p3, %p719_p7 }
 0x32a   : > { %p717_p2 = pneg %p716_p1 }
 0x32b   : > { %p723_p6 = por %p722_p4, %p721_p13 }
 0x32d   : > { %p724_p8 = pnand %p723_p6, %p717_p2 }
 0x32f   : > { %727 = shalt.err (!%p724_p8)
}
 0x330   : > { %557 = dma.vmem_to_hbm [thread:$0]  (%p912_p10), %s993_s18, 128, %s991_s26, %s390_s15  }
 0x331 PF: > { %s416_s20 = sand.u32 1, %s766_s12   ;;  %p1061_p12 = scmp.ne.s32.totalorder %s1051_s23, 0 }
 0x332   : > { %p1062_p11 = scmp.ge.s32.totalorder %s786_s17, 2  ;;  %s417_s10 = scalar_lea.sflag [#allocation6], %s416_s20 }
 0x334   : > { %p568_p0 = pnand %p1062_p11, %p1061_p12 }
 0x336   : > { %761 = dma.done.wait (!%p568_p0), %s417_s10, 128  }
 0x337   : > { %763 = vsyncadd (!%p568_p0), %s417_s10, 4294967168  ;;  %s20_s17 = sadd.s32 1, %s786_s17   ;;  %s1063_s12 = smov %s770_s13 }
 0x338   : > { %p17_p5 = scmp.ge.s32.totalorder %s20_s17, 4   ;;  %s1064_s13 = smov %s774_s14 }
 0x339   : > { %s1065_s14 = smov %s921_s5  ;;  %s1066_s15 = smov %s782_s16 }
 0x33a   : > { %s1067_s16 = smov %s1069_s28  ;;  %19 = sbr.rel (!%p17_p5) target bundleno = 7 (0x7), region = 86 }
 0x341   :  { %422 = vsyncpa [#allocation5], 1 }
 0x342   :  { %424 = vsyncpa [#allocation5 + $0x1], 1 }
 0x343   :  { %425 = vsyncpa [#allocation8], 1 }
 0x344   :  { %426 = vsyncpa [#allocation6], 1 }
 0x345   :  { %428 = vsyncpa [#allocation6 + $0x1], 1 }

</bundles_post_ra>
